<compile_context>
chip_gen: v7x
topology: tpu7x:2x2x1
jax: 0.10.0
libtpu: 0.0.40
codegen_flags: <defaults>
</compile_context>

<pallas_src>
import jax
import jax.numpy as jnp
from jax.experimental import pallas as pl
from jax.experimental.pallas import tpu as pltpu


def _ffn_kernel(x_ref, gamma_ref, beta_ref, w1_ref, b1_ref, w2_ref, b2_ref,
                o_ref, xn_ref, acc_ref):
    k = pl.program_id(1)
    nk = pl.num_programs(1)

    @pl.when(k == 0)
    def _():
        # LayerNorm once per row tile (eps matches torch default 1e-5).
        # Two-pass variance: avoids the catastrophic cancellation / negative
        # variance of E[x^2] - mean^2.
        x = x_ref[...].astype(jnp.float32)
        mean = jnp.mean(x, axis=-1, keepdims=True)
        xc = x - mean
        var = jnp.mean(xc * xc, axis=-1, keepdims=True)
        xn = xc * jax.lax.rsqrt(var + 1e-5)
        xn = xn * gamma_ref[...].astype(jnp.float32) \
             + beta_ref[...].astype(jnp.float32)
        # Cache in the weight dtype so both matmuls hit the MXU's native path
        # (bf16 x bf16) when the weights are bf16, and the cache is half size.
        xn_ref[...] = xn.astype(xn_ref.dtype)

    # ---- Linear 1 chunk: (tm, D) @ (D, tk) on the MXU, f32 accumulate ----
    h = jnp.dot(xn_ref[...], w1_ref[...], preferred_element_type=jnp.float32)
    h = h + b1_ref[...].astype(jnp.float32)

    # ---- SiLU (sigmoid goes to the EUP slot) ----
    h = h * jax.nn.sigmoid(h)

    # TODO(synk): dropout is identity here (inference mode); training-mode
    # dropout would use pltpu.prng_seed / pltpu.prng_random_bits.

    # ---- Linear 2 chunk, accumulated over H tiles in f32 ----
    part = jnp.dot(h.astype(w2_ref.dtype), w2_ref[...],
                   preferred_element_type=jnp.float32)

    @pl.when(k == 0)
    def _():
        acc_ref[...] = part            # first chunk: no zero-store + reload

    @pl.when(k > 0)
    def _():
        acc_ref[...] += part

    @pl.when(k == nk - 1)
    def _():
        o_ref[...] = (acc_ref[...] + b2_ref[...].astype(jnp.float32)
                      ).astype(o_ref.dtype)


def _round_up(n, m):
    return -(-n // m) * m


def _pick_hidden_tile(H):
    for tk in (512, 256, 128):
        if H % tk == 0:
            return tk
    return H


def _vmem_capacity_bytes():
    try:
        return int(pltpu.get_tpu_info().vmem_capacity_bytes)
    except Exception:
        return 64 * 1024 * 1024        # conservative (v7x per-TC VMEM)


def _fits_vmem(tm, tk, D, x_item, w_item, budget):
    """Rough VMEM footprint for one pipelined step (2 buffers per input)."""
    wbytes = 2 * 2 * D * tk * w_item          # w1 + w2 chunks, double-buffered
    xbytes = 2 * tm * D * x_item              # x row tile, double-buffered
    obytes = 2 * tm * D * x_item              # output tile, double-buffered
    sbytes = tm * D * w_item + tm * D * 4     # xn cache + f32 accumulator
    hbytes = 2 * tm * tk * 4                  # h intermediate (f32 + cast copy)
    misc = 4 * 4 * (3 * D + tk) + (2 << 20)   # gamma/beta/biases + slack
    return wbytes + xbytes + obytes + sbytes + hbytes + misc <= budget


def feed_forward(x, gamma, beta, w1, b1, w2, b2, *,
                 block_rows=None, block_hidden=None):
    """Conformer FeedForward: LayerNorm -> Linear -> SiLU -> Linear.

    x: (B, S, D). Weights: w1 (D, H), b1 (H,), w2 (H, D), b2 (D,).
    (PyTorch nn.Linear stores weight as (out, in); pass the transpose.)
    Dropout is identity (eval mode).
    """
    B, S, D = x.shape
    H = w1.shape[1]
    M = B * S
    x2 = x.reshape(M, D)

    x_item = jnp.dtype(x.dtype).itemsize
    w_item = jnp.dtype(w1.dtype).itemsize
    row_align = 8 if x_item >= 4 else 16

    # Generation-aware VMEM limit: ~102 MiB on 128-MiB chips (v5e/v6e),
    # ~48 MiB on 64-MiB-per-TC chips (v7x).
    vmem_cap = _vmem_capacity_bytes()
    vmem_limit = max(32 << 20, min(int(vmem_cap * 0.8), vmem_cap - (16 << 20)))
    budget = int(vmem_limit * 0.9)

    m_cap = _round_up(max(M, 1), row_align)

    # ---- tile selection --------------------------------------------------
    tm = block_rows
    tk = block_hidden
    if tk is None:
        # Prefer fully VMEM-resident weights: with tk == H their block index
        # never changes, so Pallas DMAs them from HBM exactly once.
        tm_probe = tm if tm is not None else min(256, m_cap)
        if _fits_vmem(tm_probe, H, D, x_item, w_item, budget):
            tk = H
        else:
            tk = _pick_hidden_tile(H)
    if tm is None:
        if tk == H:
            tm = min(256, m_cap)
        else:
            # H-tiled weights are re-streamed per row tile: make the row tile
            # big enough to stay above the HBM roofline (bf16 wants ~672+ on
            # v6e), bounded by the VMEM budget.
            tm = min(768 if w_item <= 2 else 512, m_cap)
            while tm > row_align and not _fits_vmem(tm, tk, D, x_item,
                                                    w_item, budget):
                new_tm = max(row_align, _round_up(tm // 2, row_align))
                if new_tm == tm:
                    break
                tm = new_tm
    assert H % tk == 0, "hidden tile must divide the hidden dim"

    # Ragged last row block is handled by Pallas (masked writes): no explicit
    # jnp.pad / output slice round trip through HBM.
    grid = (pl.cdiv(M, tm), H // tk)

    out = pl.pallas_call(
        _ffn_kernel,
        out_shape=jax.ShapeDtypeStruct((M, D), x.dtype),
        grid_spec=pltpu.PrefetchScalarGridSpec(
            num_scalar_prefetch=0,
            grid=grid,
            in_specs=[
                pl.BlockSpec((tm, D), lambda i, k: (i, 0)),   # x rows
                pl.BlockSpec((1, D), lambda i, k: (0, 0)),    # gamma
                pl.BlockSpec((1, D), lambda i, k: (0, 0)),    # beta
                pl.BlockSpec((D, tk), lambda i, k: (0, k)),   # w1 chunk
                pl.BlockSpec((1, tk), lambda i, k: (0, k)),   # b1 chunk
                pl.BlockSpec((tk, D), lambda i, k: (k, 0)),   # w2 chunk
                pl.BlockSpec((1, D), lambda i, k: (0, 0)),    # b2
            ],
            out_specs=pl.BlockSpec((tm, D), lambda i, k: (i, 0)),
            scratch_shapes=[
                pltpu.VMEM((tm, D), w1.dtype),      # LayerNorm cache (matmul dtype)
                pltpu.VMEM((tm, D), jnp.float32),   # f32 output accumulator
            ],
        ),
        compiler_params=pltpu.CompilerParams(
            dimension_semantics=("parallel", "arbitrary"),
            vmem_limit_bytes=vmem_limit,
        ),
    )(x2, gamma.reshape(1, D), beta.reshape(1, D),
      w1, b1.reshape(1, H), w2, b2.reshape(1, D))

    return out.reshape(B, S, D)


def _reference(x, gamma, beta, w1, b1, w2, b2):
    xf = x.astype(jnp.float32)
    mean = jnp.mean(xf, axis=-1, keepdims=True)
    var = jnp.mean((xf - mean) ** 2, axis=-1, keepdims=True)
    xn = (xf - mean) * jax.lax.rsqrt(var + 1e-5) * gamma.astype(jnp.float32) \
         + beta.astype(jnp.float32)
    h = xn @ w1.astype(jnp.float32) + b1.astype(jnp.float32)
    h = h * jax.nn.sigmoid(h)
    return (h @ w2.astype(jnp.float32) + b2.astype(jnp.float32)).astype(x.dtype)


if __name__ == "__main__":
    key = jax.random.PRNGKey(0)
    B, S, D, EXP = 2, 8, 128, 4      # D multiple of 128 -> lane-dense stores
    H = D * EXP

    ks = jax.random.split(key, 7)
    x = jax.random.normal(ks[0], (B, S, D), jnp.float32)
    gamma = 1.0 + 0.1 * jax.random.normal(ks[1], (D,), jnp.float32)
    beta = 0.05 * jax.random.normal(ks[2], (D,), jnp.float32)
    # PyTorch Linear stores weight as (out, in); pre-transposed to (in, out).
    w1 = jax.random.normal(ks[3], (D, H), jnp.float32) * (1.0 / D ** 0.5)
    b1 = 0.01 * jax.random.normal(ks[4], (H,), jnp.float32)
    w2 = jax.random.normal(ks[5], (H, D), jnp.float32) * (1.0 / H ** 0.5)
    b2 = 0.01 * jax.random.normal(ks[6], (D,), jnp.float32)

    y_ref = _reference(x, gamma, beta, w1, b1, w2, b2)

    # 1) Default tiling: weights resident in VMEM (single HBM fetch).
    y = feed_forward(x, gamma, beta, w1, b1, w2, b2)
    jax.block_until_ready(y)
    assert jnp.allclose(y, y_ref, atol=2e-4, rtol=2e-4), "mismatch (resident)"

    # 2) Forced H-tiled reduction path (grid = (2, 4)), f32 accumulator.
    y_t = feed_forward(x, gamma, beta, w1, b1, w2, b2,
                       block_rows=8, block_hidden=128)
    jax.block_until_ready(y_t)
    assert jnp.allclose(y_t, y_ref, atol=2e-4, rtol=2e-4), "mismatch (H-tiled)"

    # 3) bf16 weights (native MXU rate), f32 activations -> mixed-dtype path.
    bf = jnp.bfloat16
    y_bf = feed_forward(x, gamma, beta, w1.astype(bf), b1.astype(bf),
                        w2.astype(bf), b2.astype(bf))
    jax.block_until_ready(y_bf)
    assert jnp.allclose(y_bf.astype(jnp.float32), y_ref,
                        atol=3e-2, rtol=3e-2), "mismatch (bf16 weights)"

    # 4) Ragged rows (M not a multiple of the row tile): masked last block.
    x_r = jax.random.normal(ks[0], (2, 5, D), jnp.float32)
    y_r = feed_forward(x_r, gamma, beta, w1, b1, w2, b2, block_rows=8)
    jax.block_until_ready(y_r)
    y_r_ref = _reference(x_r, gamma, beta, w1, b1, w2, b2)
    assert jnp.allclose(y_r, y_r_ref, atol=2e-4, rtol=2e-4), "mismatch (ragged)"

    print("KERNEL_OK")
</pallas_src>

<mosaic_0001>
module attributes {stable_mosaic.version = 11 : i64} {
  func.func @_ffn_kernel(%arg0: i32, %arg1: i32, %arg2: memref<16x128xf32, #tpu.memory_space<vmem>>, %arg3: memref<1x128xf32, #tpu.memory_space<vmem>>, %arg4: memref<1x128xf32, #tpu.memory_space<vmem>>, %arg5: memref<128x512xf32, #tpu.memory_space<vmem>>, %arg6: memref<1x512xf32, #tpu.memory_space<vmem>>, %arg7: memref<512x128xf32, #tpu.memory_space<vmem>>, %arg8: memref<1x128xf32, #tpu.memory_space<vmem>>, %arg9: memref<16x128xf32, #tpu.memory_space<vmem>>, %arg10: memref<16x128xf32, #tpu.memory_space<vmem>>, %arg11: memref<16x128xf32, #tpu.memory_space<vmem>>) attributes {dimension_semantics = [#tpu.dimension_semantics<parallel>, #tpu.dimension_semantics<arbitrary>], iteration_bounds = array<i64: 1, 1>, scalar_prefetch = 0 : i64, scratch_operands = 2 : i64, tpu.core_type = #tpu.core_type<tc>, window_params = [{transform_indices = @transform_0, window_bounds = array<i64: 16, 128>}, {pipeline_mode = #tpu.pipeline_mode<synchronous>, transform_indices = @transform_1, window_bounds = array<i64: 1, 128>}, {pipeline_mode = #tpu.pipeline_mode<synchronous>, transform_indices = @transform_2, window_bounds = array<i64: 1, 128>}, {transform_indices = @transform_3, window_bounds = array<i64: 128, 512>}, {transform_indices = @transform_4, window_bounds = array<i64: 1, 512>}, {transform_indices = @transform_5, window_bounds = array<i64: 512, 128>}, {pipeline_mode = #tpu.pipeline_mode<synchronous>, transform_indices = @transform_6, window_bounds = array<i64: 1, 128>}, {transform_indices = @transform_7, window_bounds = array<i64: 16, 128>}]} {
    %c0_i32 = arith.constant 0 : i32
    %0 = arith.cmpi eq, %arg1, %c0_i32 : i32
    %1 = arith.extui %0 : i1 to i32
    %c0_i32_0 = arith.constant 0 : i32
    %2 = arith.cmpi ne, %1, %c0_i32_0 : i32
    scf.if %2 {
      %c0_16 = arith.constant 0 : index
      %c0_17 = arith.constant 0 : index
      %26 = vector.load %arg2[%c0_16, %c0_17] : memref<16x128xf32, #tpu.memory_space<vmem>>, vector<16x128xf32>
      %cst_18 = arith.constant dense<0.000000e+00> : vector<16xf32>
      %27 = vector.multi_reduction <add>, %26, %cst_18 [1] : vector<16x128xf32> to vector<16xf32>
      %28 = vector.shape_cast %27 : vector<16xf32> to vector<16x1xf32>
      %cst_19 = arith.constant 1.280000e+02 : f32
      %29 = vector.broadcast %cst_19 : f32 to vector<16x1xf32>
      %30 = arith.divf %28, %29 : vector<16x1xf32>
      %31 = vector.broadcast %30 : vector<16x1xf32> to vector<16x128xf32>
      %32 = arith.subf %26, %31 : vector<16x128xf32>
      %33 = arith.mulf %32, %32 : vector<16x128xf32>
      %cst_20 = arith.constant dense<0.000000e+00> : vector<16xf32>
      %34 = vector.multi_reduction <add>, %33, %cst_20 [1] : vector<16x128xf32> to vector<16xf32>
      %35 = vector.shape_cast %34 : vector<16xf32> to vector<16x1xf32>
      %cst_21 = arith.constant 1.280000e+02 : f32
      %36 = vector.broadcast %cst_21 : f32 to vector<16x1xf32>
      %37 = arith.divf %35, %36 : vector<16x1xf32>
      %cst_22 = arith.constant 9.99999974E-6 : f32
      %38 = vector.broadcast %cst_22 : f32 to vector<16x1xf32>
      %39 = arith.addf %37, %38 : vector<16x1xf32>
      %40 = math.rsqrt %39 : vector<16x1xf32>
      %41 = vector.broadcast %40 : vector<16x1xf32> to vector<16x128xf32>
      %42 = arith.mulf %32, %41 : vector<16x128xf32>
      %c0_23 = arith.constant 0 : index
      %c0_24 = arith.constant 0 : index
      %43 = vector.load %arg3[%c0_23, %c0_24] : memref<1x128xf32, #tpu.memory_space<vmem>>, vector<1x128xf32>
      %44 = vector.broadcast %43 : vector<1x128xf32> to vector<16x128xf32>
      %45 = arith.mulf %42, %44 : vector<16x128xf32>
      %c0_25 = arith.constant 0 : index
      %c0_26 = arith.constant 0 : index
      %46 = vector.load %arg4[%c0_25, %c0_26] : memref<1x128xf32, #tpu.memory_space<vmem>>, vector<1x128xf32>
      %47 = vector.broadcast %46 : vector<1x128xf32> to vector<16x128xf32>
      %48 = arith.addf %45, %47 : vector<16x128xf32>
      %c0_27 = arith.constant 0 : index
      %c0_28 = arith.constant 0 : index
      %49 = vector.load %arg10[%c0_27, %c0_28] : memref<16x128xf32, #tpu.memory_space<vmem>>, vector<16x128xf32>
      tpu.vector_store %arg10[%c0_27, %c0_28], %48 {strides = array<i32>} : memref<16x128xf32, #tpu.memory_space<vmem>>, vector<16x128xf32>,
    } else {
    }
    %c0 = arith.constant 0 : index
    %c0_1 = arith.constant 0 : index
    %3 = vector.load %arg10[%c0, %c0_1] : memref<16x128xf32, #tpu.memory_space<vmem>>, vector<16x128xf32>
    %c0_2 = arith.constant 0 : index
    %c0_3 = arith.constant 0 : index
    %4 = vector.load %arg5[%c0_2, %c0_3] : memref<128x512xf32, #tpu.memory_space<vmem>>, vector<128x512xf32>
    %cst = arith.constant dense<0.000000e+00> : vector<16x512xf32>
    %5 = tpu.matmul %3, %4, %cst {dimension_numbers = #tpu.dot_dimension_numbers<[1], [0], [0], [1], [0, 0, 1, 1], [], []>} : vector<16x128xf32>, vector<128x512xf32>, vector<16x512xf32> -> vector<16x512xf32>
    %c0_4 = arith.constant 0 : index
    %c0_5 = arith.constant 0 : index
    %6 = vector.load %arg6[%c0_4, %c0_5] : memref<1x512xf32, #tpu.memory_space<vmem>>, vector<1x512xf32>
    %7 = vector.broadcast %6 : vector<1x512xf32> to vector<16x512xf32>
    %8 = arith.addf %5, %7 : vector<16x512xf32>
    %9 = arith.negf %8 : vector<16x512xf32>
    %10 = math.exp %9 : vector<16x512xf32>
    %cst_6 = arith.constant 1.000000e+00 : f32
    %11 = vector.broadcast %cst_6 : f32 to vector<16x512xf32>
    %12 = arith.addf %11, %10 : vector<16x512xf32>
    %13 = arith.divf %11, %12 : vector<16x512xf32>
    %14 = arith.mulf %8, %13 : vector<16x512xf32>
    %c0_7 = arith.constant 0 : index
    %c0_8 = arith.constant 0 : index
    %15 = vector.load %arg7[%c0_7, %c0_8] : memref<512x128xf32, #tpu.memory_space<vmem>>, vector<512x128xf32>
    %cst_9 = arith.constant dense<0.000000e+00> : vector<16x128xf32>
    %16 = tpu.matmul %14, %15, %cst_9 {dimension_numbers = #tpu.dot_dimension_numbers<[1], [0], [0], [1], [0, 0, 1, 1], [], []>} : vector<16x512xf32>, vector<512x128xf32>, vector<16x128xf32> -> vector<16x128xf32>
    %c0_i32_10 = arith.constant 0 : i32
    %17 = arith.cmpi eq, %arg1, %c0_i32_10 : i32
    %18 = arith.extui %17 : i1 to i32
    %c0_i32_11 = arith.constant 0 : i32
    %19 = arith.cmpi ne, %18, %c0_i32_11 : i32
    scf.if %19 {
      %c0_16 = arith.constant 0 : index
      %c0_17 = arith.constant 0 : index
      %26 = vector.load %arg11[%c0_16, %c0_17] : memref<16x128xf32, #tpu.memory_space<vmem>>, vector<16x128xf32>
      tpu.vector_store %arg11[%c0_16, %c0_17], %16 {strides = array<i32>} : memref<16x128xf32, #tpu.memory_space<vmem>>, vector<16x128xf32>,
    } else {
    }
    %c0_i32_12 = arith.constant 0 : i32
    %20 = arith.cmpi sgt, %arg1, %c0_i32_12 : i32
    %21 = arith.extui %20 : i1 to i32
    %c0_i32_13 = arith.constant 0 : i32
    %22 = arith.cmpi ne, %21, %c0_i32_13 : i32
    scf.if %22 {
      %c0_16 = arith.constant 0 : index
      %c0_17 = arith.constant 0 : index
      %26 = vector.load %arg11[%c0_16, %c0_17] : memref<16x128xf32, #tpu.memory_space<vmem>>, vector<16x128xf32>
      %27 = arith.addf %26, %16 : vector<16x128xf32>
      %c0_18 = arith.constant 0 : index
      %c0_19 = arith.constant 0 : index
      %28 = vector.load %arg11[%c0_18, %c0_19] : memref<16x128xf32, #tpu.memory_space<vmem>>, vector<16x128xf32>
      tpu.vector_store %arg11[%c0_18, %c0_19], %27 {strides = array<i32>} : memref<16x128xf32, #tpu.memory_space<vmem>>, vector<16x128xf32>,
    } else {
    }
    %c0_i32_14 = arith.constant 0 : i32
    %23 = arith.cmpi eq, %arg1, %c0_i32_14 : i32
    %24 = arith.extui %23 : i1 to i32
    %c0_i32_15 = arith.constant 0 : i32
    %25 = arith.cmpi ne, %24, %c0_i32_15 : i32
    scf.if %25 {
      %c0_16 = arith.constant 0 : index
      %c0_17 = arith.constant 0 : index
      %26 = vector.load %arg11[%c0_16, %c0_17] : memref<16x128xf32, #tpu.memory_space<vmem>>, vector<16x128xf32>
      %c0_18 = arith.constant 0 : index
      %c0_19 = arith.constant 0 : index
      %27 = vector.load %arg8[%c0_18, %c0_19] : memref<1x128xf32, #tpu.memory_space<vmem>>, vector<1x128xf32>
      %28 = vector.broadcast %27 : vector<1x128xf32> to vector<16x128xf32>
      %29 = arith.addf %26, %28 : vector<16x128xf32>
      %c0_20 = arith.constant 0 : index
      %c0_21 = arith.constant 0 : index
      %30 = vector.load %arg9[%c0_20, %c0_21] : memref<16x128xf32, #tpu.memory_space<vmem>>, vector<16x128xf32>
      tpu.vector_store %arg9[%c0_20, %c0_21], %29 {strides = array<i32>} : memref<16x128xf32, #tpu.memory_space<vmem>>, vector<16x128xf32>,
    } else {
    }
    return
  }
  func.func @transform_0(%arg0: i32, %arg1: i32) -> (i32, i32) {
    %c0_i32 = arith.constant 0 : i32
    %c0_i32_0 = arith.constant 0 : i32
    return %arg0, %c0_i32 : i32, i32
  }
  func.func @transform_1(%arg0: i32, %arg1: i32) -> (i32, i32) {
    %c0_i32 = arith.constant 0 : i32
    %c0_i32_0 = arith.constant 0 : i32
    %c0_i32_1 = arith.constant 0 : i32
    return %c0_i32, %c0_i32_0 : i32, i32
  }
  func.func @transform_2(%arg0: i32, %arg1: i32) -> (i32, i32) {
    %c0_i32 = arith.constant 0 : i32
    %c0_i32_0 = arith.constant 0 : i32
    %c0_i32_1 = arith.constant 0 : i32
    return %c0_i32, %c0_i32_0 : i32, i32
  }
  func.func @transform_3(%arg0: i32, %arg1: i32) -> (i32, i32) {
    %c0_i32 = arith.constant 0 : i32
    %c0_i32_0 = arith.constant 0 : i32
    return %c0_i32, %arg1 : i32, i32
  }
  func.func @transform_4(%arg0: i32, %arg1: i32) -> (i32, i32) {
    %c0_i32 = arith.constant 0 : i32
    %c0_i32_0 = arith.constant 0 : i32
    return %c0_i32, %arg1 : i32, i32
  }
  func.func @transform_5(%arg0: i32, %arg1: i32) -> (i32, i32) {
    %c0_i32 = arith.constant 0 : i32
    %c0_i32_0 = arith.constant 0 : i32
    return %arg1, %c0_i32 : i32, i32
  }
  func.func @transform_6(%arg0: i32, %arg1: i32) -> (i32, i32) {
    %c0_i32 = arith.constant 0 : i32
    %c0_i32_0 = arith.constant 0 : i32
    %c0_i32_1 = arith.constant 0 : i32
    return %c0_i32, %c0_i32_0 : i32, i32
  }
  func.func @transform_7(%arg0: i32, %arg1: i32) -> (i32, i32) {
    %c0_i32 = arith.constant 0 : i32
    %c0_i32_0 = arith.constant 0 : i32
    return %arg0, %c0_i32 : i32, i32
  }
}

</mosaic_0001>

<bundles_post_ra>
// kernel: tpu_custom_call.1
= control target key start
LH: loop header
LB: loop body
LE: loop exit
PB: predicated region body
PF: predicated region fallthrough
CT: control target
= control target key end

     0   :  { %12 = vsyncpa [#allocation5], 0  ;;  %s1160_s0 = inlined_call_operand.hbm [shape: f32[16,128], index: 0, kind: input, shape index: {}]   ;;  %s1161_s1 = inlined_call_operand.vmem [shape: f32[1,128], index: 1, kind: input, shape index: {}]   ;;  %s1162_s2 = inlined_call_operand.vmem [shape: f32[1,128], index: 2, kind: input, shape index: {}]   ;;  %s1163_s3 = inlined_call_operand.hbm [shape: f32[128,512], index: 3, kind: input, shape index: {}]   ;;  %s1164_s4 = inlined_call_operand.vmem [shape: f32[1,512], index: 4, kind: input, shape index: {}]   ;;  %s1165_s5 = inlined_call_operand.hbm [shape: f32[512,128], index: 5, kind: input, shape index: {}]   ;;  %s1166_s6 = inlined_call_operand.vmem [shape: f32[1,128], index: 6, kind: input, shape index: {}]   ;;  %s1167_s7 = inlined_call_operand.hbm [shape: f32[16,128], index: 7, kind: output, shape index: {}]  }
   0x1   :  { %13 = vsyncpa [#allocation8], 0 }
   0x2   :  { %14 = vsyncpa [#allocation6], 0  ;;  %s1032_s24 = smov [#allocation7]   ;;  %s938_s28 = scalar_lea.hbm %s1163_s3, 8192 }
   0x3   :  { %s36_s25 = sshll.u32 %s1032_s24, 4  ;;  %p939_p0 = scmp.ne.s32.totalorder %s1163_s3, %s938_s28  ;;  %s37_s25 = int_to_ptr.vmem [resolvable:$true] %s36_s25 }
   0x4   :  { %p942_p1 = scmp.lt.u32.totalorder %s938_s28, %s1163_s3 }
   0x6   :  { %p944_p2 = pnand %p942_p1, %p939_p0 }
   0x8   :  { %947 = shalt.err (!%p944_p2)
}
   0x9   :  { %s948_s10 = scalar_lea.vmem %s37_s25, 8192  ;;  %p953_p4 = scmp.lt.s32.totalorder %s37_s25, %s37_s25 }
   0xa   :  { %p949_p3 = scmp.ne.s32.totalorder %s37_s25, %s948_s10  ;;  %p954_p5 = scmp.lt.s32.totalorder %s948_s10, %s948_s10 }
   0xc   :  { %p955_p6 = por %p954_p5, %p953_p4 }
   0xe   :  { %p956_p7 = pnand %p955_p6, %p949_p3 }
  0x10   :  { %959 = shalt.err (!%p956_p7)
}
  0x11   :  { %s1033_s11 = smov 512   ;;  %s1034_s12 = smov 32  }
  0x12   :  { %42 = dma.hbm_to_vmem [thread:$0]  %s1163_s3, 8192, %s37_s25, [#allocation8], %s1033_s11, %s1033_s11, %s1034_s12  }
  0x13   :  { %s1035_s15 = smov [#allocation4]   ;;  %s960_s19 = scalar_lea.hbm %s1160_s0, 256 }
  0x14   :  { %s20_s16 = sshll.u32 %s1035_s15, 4  ;;  %p961_p8 = scmp.ne.s32.totalorder %s1160_s0, %s960_s19  ;;  %s21_s16 = int_to_ptr.vmem [resolvable:$true] %s20_s16 }
  0x15   :  { %p964_p9 = scmp.lt.u32.totalorder %s960_s19, %s1160_s0 }
  0x17   :  { %p966_p10 = pnand %p964_p9, %p961_p8 }
  0x19   :  { %969 = shalt.err (!%p966_p10)
}
  0x1a   :  { %s970_s24 = scalar_lea.vmem %s21_s16, 256  ;;  %p975_p12 = scmp.lt.s32.totalorder %s21_s16, %s21_s16 }
  0x1b   :  { %p971_p11 = scmp.ne.s32.totalorder %s21_s16, %s970_s24  ;;  %p976_p13 = scmp.lt.s32.totalorder %s970_s24, %s970_s24 }
  0x1d   :  { %p977_p0 = por %p976_p13, %p975_p12 }
  0x1f   :  { %p978_p1 = pnand %p977_p0, %p971_p11 }
  0x21   :  { %981 = shalt.err (!%p978_p1)
}
  0x22   :  { %s1036_s3 = smov 128   ;;  %s1037_s25 = smov 8  }
  0x23   :  { %26 = dma.hbm_to_vmem [thread:$0]  %s1160_s0, 256, %s21_s16, [#allocation5], %s1036_s3, %s1036_s3, %s1037_s25  }
  0x24   :  { %s1038_s28 = smov [#allocation9]   ;;  %s982_s9 = scalar_lea.hbm %s1165_s5, 8192 }
  0x25   :  { %s50_s29 = sshll.u32 %s1038_s28, 4  ;;  %p983_p2 = scmp.ne.s32.totalorder %s1165_s5, %s982_s9  ;;  %s51_s29 = int_to_ptr.vmem [resolvable:$true] %s50_s29 }
  0x26   :  { %p986_p3 = scmp.lt.u32.totalorder %s982_s9, %s1165_s5 }
  0x28   :  { %p988_p4 = pnand %p986_p3, %p983_p2 }
  0x2a   :  { %991 = shalt.err (!%p988_p4)
}
  0x2b   :  { %s992_s14 = scalar_lea.vmem %s51_s29, 8192  ;;  %p997_p6 = scmp.lt.s32.totalorder %s51_s29, %s51_s29 }
  0x2c   :  { %p993_p5 = scmp.ne.s32.totalorder %s51_s29, %s992_s14  ;;  %p998_p7 = scmp.lt.s32.totalorder %s992_s14, %s992_s14 }
  0x2e   :  { %p999_p8 = por %p998_p7, %p997_p6 }
  0x30   :  { %p1000_p9 = pnand %p999_p8, %p993_p5 }
  0x32   :  { %1003 = shalt.err (!%p1000_p9)
}
  0x33   :  { %56 = dma.hbm_to_vmem [thread:$0]  %s1165_s5, 8192, %s51_s29, [#allocation8], %s1036_s3, %s1036_s3, %s1037_s25  }
  0x34   :  { %1026 = dma.done.wait [#allocation5], 256  }
  0x35   :  { %1027 = vsyncadd [#allocation5], 4294967040 }
  0x36   :  { %1028 = dma.done.wait [#allocation8], 16384  }
  0x37   :  { %1029 = vsyncadd [#allocation8], 4294950912  ;;  %v72_v0 = vld [vmem:[#allocation4] sm:$0xff]  ;;  %v73_v1 = vld [vmem:[#allocation4 + $0x8] sm:$0xff]  ;;  %s1040_s20 = smov [#allocation10]  }
  0x38   :  { %74 = vadd.xlane.f32.xlu0 %v72_v0  ;;  %v120_v2 = vld [vmem:[#allocation7 + $0x8] sm:$0xff]  ;;  %v122_v4 = vld [vmem:[#allocation7 + $0x18] sm:$0xff]  ;;  %v119_v7 = vld [vmem:[#allocation7] sm:$0xff]  ;;  %s665_s21 = sshll.u32 %s1040_s20, 4  ;;  %s666_s21 = int_to_ptr.vmem [resolvable:$true] %s665_s21 }
  0x39   :  { %v124_v3 = vld [vmem:[#allocation7 + $0x28] sm:$0xff]  ;;  %v126_v6 = vld [vmem:[#allocation7 + $0x38] sm:$0xff]  ;;  %v123_v8 = vld [vmem:[#allocation7 + $0x20] sm:$0xff]  ;;  %s1004_s22 = scalar_lea.vmem %s666_s21, 256  ;;  %p1009_p11 = scmp.lt.s32.totalorder %s666_s21, %s666_s21 }
  0x3a   :  { %v765_v5 = vpack.c.bf16 %v124_v3, %v120_v2  ;;  %v797_v9 = vpack.c.bf16 %v126_v6, %v122_v4  ;;  %v767_v10 = vpack.c.bf16 %v123_v8, %v119_v7  ;;  %v121_v11 = vld [vmem:[#allocation7 + $0x10] sm:$0xff]  ;;  %v128_v13 = vld [vmem:[#allocation7 + $0x48] sm:$0xff]  ;;  %v130_v16 = vld [vmem:[#allocation7 + $0x58] sm:$0xff]  ;;  %p1005_p10 = scmp.ne.s32.totalorder %s666_s21, %s1004_s22  ;;  %p1010_p12 = scmp.lt.s32.totalorder %s1004_s22, %s1004_s22 }
  0x3b   :  { %v125_v12 = vld [vmem:[#allocation7 + $0x30] sm:$0xff]  ;;  %v132_v15 = vld [vmem:[#allocation7 + $0x68] sm:$0xff]  ;;  %v134_v17 = vld [vmem:[#allocation7 + $0x78] sm:$0xff] }
  0x3c   :  { %76 = vadd.xlane.f32.xlu0 %v73_v1  ;;  %766 = vmatprep.subr.bf16.mxu0 %v765_v5  ;;  %v799_v14 = vpack.c.bf16 %v125_v12, %v121_v11  ;;  %v769_v18 = vpack.c.bf16 %v132_v15, %v128_v13  ;;  %v801_v19 = vpack.c.bf16 %v134_v17, %v130_v16  ;;  %v127_v20 = vld [vmem:[#allocation7 + $0x40] sm:$0xff]  ;;  %v129_v22 = vld [vmem:[#allocation7 + $0x50] sm:$0xff]  ;;  %v136_v25 = vld [vmem:[#allocation7 + $0x88] sm:$0xff]  ;;  %p1011_p13 = por %p1010_p12, %p1009_p11 }
  0x3d   :  { %798 = vmatprep.subr.bf16.mxu1 %v797_v9  ;;  %768 = vmatpush1.bf16.msra.mxu0 %v767_v10  ;;  %v131_v21 = vld [vmem:[#allocation7 + $0x60] sm:$0xff]  ;;  %v133_v24 = vld [vmem:[#allocation7 + $0x70] sm:$0xff]  ;;  %v140_v26 = vld [vmem:[#allocation7 + $0xa8] sm:$0xff] }
  0x3e   :  { %800 = vmatpush1.bf16.msra.mxu1 %v799_v14  ;;  %v771_v23 = vpack.c.bf16 %v131_v21, %v127_v20  ;;  %770 = vmatprep.subr.bf16.mxu0 %v769_v18  ;;  %v803_v27 = vpack.c.bf16 %v133_v24, %v129_v22  ;;  %v773_v28 = vpack.c.bf16 %v140_v26, %v136_v25  ;;  %v138_v29 = vld [vmem:[#allocation7 + $0x98] sm:$0xff]  ;;  %v135_v31 = vld [vmem:[#allocation7 + $0x80] sm:$0xff]  ;;  %v137_v34 = vld [vmem:[#allocation7 + $0x90] sm:$0xff]  ;;  %v1039_v22 = vmov 0.0   ;;  %p1012_p0 = pnand %p1011_p13, %p1005_p10 }
  0x3f   :  { %802 = vmatprep.subr.bf16.mxu1 %v801_v19  ;;  %v142_v30 = vld [vmem:[#allocation7 + $0xb8] sm:$0xff]  ;;  %v139_v33 = vld [vmem:[#allocation7 + $0xa0] sm:$0xff]  ;;  %v141_v35 = vld [vmem:[#allocation7 + $0xb0] sm:$0xff]  ;;  %269 = vmatprep.mubr.f32.mxu0 %v1039_v22 }
  0x40   :  { %v805_v32 = vpack.c.bf16 %v142_v30, %v138_v29  ;;  %v775_v36 = vpack.c.bf16 %v139_v33, %v135_v31  ;;  %v807_v37 = vpack.c.bf16 %v141_v35, %v137_v34  ;;  %v144_v46 = vld [vmem:[#allocation7 + $0xc8] sm:$0xff]  ;;  %v146_v48 = vld [vmem:[#allocation7 + $0xd8] sm:$0xff]  ;;  %v143_v51 = vld [vmem:[#allocation7 + $0xc0] sm:$0xff]  ;;  %346 = vmatprep.mubr.f32.mxu1 %v1039_v22 }
  0x41   :  { %772 = vmatpush1.bf16.msra.mxu0 %v771_v23  ;;  %v148_v47 = vld [vmem:[#allocation7 + $0xe8] sm:$0xff]  ;;  %v150_v50 = vld [vmem:[#allocation7 + $0xf8] sm:$0xff]  ;;  %v147_v52 = vld [vmem:[#allocation7 + $0xe0] sm:$0xff] }
  0x42   :  { %804 = vmatpush1.bf16.msra.mxu1 %v803_v27  ;;  %774 = vmatprep.subr.bf16.mxu0 %v773_v28  ;;  %v777_v49 = vpack.c.bf16 %v148_v47, %v144_v46  ;;  %v809_v53 = vpack.c.bf16 %v150_v50, %v146_v48  ;;  %v779_v54 = vpack.c.bf16 %v147_v52, %v143_v51  ;;  %v145_v55 = vld [vmem:[#allocation7 + $0xd0] sm:$0xff]  ;;  %v152_v58 = vld [vmem:[#allocation7 + $0x108] sm:$0xff]  ;;  %v154_v60 = vld [vmem:[#allocation7 + $0x118] sm:$0xff] }
  0x43   :  { %806 = vmatprep.subr.bf16.mxu1 %v805_v32  ;;  %v149_v56 = vld [vmem:[#allocation7 + $0xf0] sm:$0xff]  ;;  %v156_v59 = vld [vmem:[#allocation7 + $0x128] sm:$0xff]  ;;  %v158_v62 = vld [vmem:[#allocation7 + $0x138] sm:$0xff] }
  0x44   :  { %v811_v57 = vpack.c.bf16 %v149_v56, %v145_v55  ;;  %v781_v61 = vpack.c.bf16 %v156_v59, %v152_v58  ;;  %v151_v63 = vld [vmem:[#allocation7 + $0x100] sm:$0xff]  ;;  %v153_v3 = vld [vmem:[#allocation7 + $0x110] sm:$0xff]  ;;  %v160_v6 = vld [vmem:[#allocation7 + $0x148] sm:$0xff] }
  0x45   :  { %776 = vmatpush1.bf16.msra.mxu0 %v775_v36  ;;  %v157_v4 = vld [vmem:[#allocation7 + $0x130] sm:$0xff]  ;;  %v164_v7 = vld [vmem:[#allocation7 + $0x168] sm:$0xff]  ;;  %v162_v8 = vld [vmem:[#allocation7 + $0x158] sm:$0xff] }
  0x46   :  { %808 = vmatpush1.bf16.msra.mxu1 %v807_v37  ;;  %778 = vmatprep.subr.bf16.mxu0 %v777_v49  ;;  %v815_v5 = vpack.c.bf16 %v157_v4, %v153_v3  ;;  %v785_v9 = vpack.c.bf16 %v164_v7, %v160_v6  ;;  %v166_v10 = vld [vmem:[#allocation7 + $0x178] sm:$0xff]  ;;  %v159_v11 = vld [vmem:[#allocation7 + $0x140] sm:$0xff]  ;;  %v161_v15 = vld [vmem:[#allocation7 + $0x150] sm:$0xff] }
  0x47   :  { %810 = vmatprep.subr.bf16.mxu1 %v809_v53  ;;  %v163_v12 = vld [vmem:[#allocation7 + $0x160] sm:$0xff]  ;;  %v817_v13 = vpack.c.bf16 %v166_v10, %v162_v8  ;;  %v165_v16 = vld [vmem:[#allocation7 + $0x170] sm:$0xff]  ;;  %v168_v17 = vld [vmem:[#allocation7 + $0x188] sm:$0xff] }
  0x48   :  { %v787_v14 = vpack.c.bf16 %v163_v12, %v159_v11  ;;  %v819_v18 = vpack.c.bf16 %v165_v16, %v161_v15  ;;  %v172_v19 = vld [vmem:[#allocation7 + $0x1a8] sm:$0xff]  ;;  %v170_v20 = vld [vmem:[#allocation7 + $0x198] sm:$0xff]  ;;  %v167_v25 = vld [vmem:[#allocation7 + $0x180] sm:$0xff] }
  0x49   :  { %780 = vmatpush1.bf16.msra.mxu0 %v779_v54  ;;  %v174_v21 = vld [vmem:[#allocation7 + $0x1b8] sm:$0xff]  ;;  %v789_v23 = vpack.c.bf16 %v172_v19, %v168_v17  ;;  %v171_v26 = vld [vmem:[#allocation7 + $0x1a0] sm:$0xff]  ;;  %v169_v27 = vld [vmem:[#allocation7 + $0x190] sm:$0xff] }
  0x4a   :  { %812 = vmatpush1.bf16.msra.mxu1 %v811_v57  ;;  %782 = vmatprep.subr.bf16.mxu0 %v781_v61  ;;  %v821_v24 = vpack.c.bf16 %v174_v21, %v170_v20  ;;  %v791_v28 = vpack.c.bf16 %v171_v26, %v167_v25  ;;  %v173_v29 = vld [vmem:[#allocation7 + $0x1b0] sm:$0xff]  ;;  %v176_v30 = vld [vmem:[#allocation7 + $0x1c8] sm:$0xff]  ;;  %v178_v34 = vld [vmem:[#allocation7 + $0x1d8] sm:$0xff] }
  0x4b   :  { %v180_v31 = vld [vmem:[#allocation7 + $0x1e8] sm:$0xff]  ;;  %v823_v32 = vpack.c.bf16 %v173_v29, %v169_v27  ;;  %v182_v35 = vld [vmem:[#allocation7 + $0x1f8] sm:$0xff]  ;;  %v175_v36 = vld [vmem:[#allocation7 + $0x1c0] sm:$0xff] }
  0x4c   :  { %v793_v33 = vpack.c.bf16 %v180_v31, %v176_v30  ;;  %v825_v37 = vpack.c.bf16 %v182_v35, %v178_v34  ;;  %v678_v52 = vld [vmem:[%s1161_s1] ss:$0 sm:$0xff]  ;;  %v431_v61 = vld [vmem:[#allocation9 + $0x80] sm:$0xff]  ;;  %v448_v6 = vld [vmem:[#allocation9 + $0x108] sm:$0xff] }
  0x4d   :  { %v679_v54 = vld [vmem:[%s1162_s2] ss:$0 sm:$0xff]  ;;  %v434_v8 = vld [vmem:[#allocation9 + $0x98] sm:$0xff]  ;;  %v435_v19 = vld [vmem:[#allocation9 + $0xa0] sm:$0xff] }
  0x4e   :  { %v433_v7 = vld [vmem:[#allocation9 + $0x90] sm:$0xff]  ;;  %v466_v11 = vld [vmem:[#allocation9 + $0x198] sm:$0xff]  ;;  %v436_v20 = vld [vmem:[#allocation9 + $0xa8] sm:$0xff] }
  0x4f   :  { %v833_v10 = vpack.c.bf16 %v434_v8, %v433_v7  ;;  %v417_v12 = vld [vmem:[#allocation9 + $0x10] sm:$0xff]  ;;  %v450_v17 = vld [vmem:[#allocation9 + $0x118] sm:$0xff]  ;;  %v467_v21 = vld [vmem:[#allocation9 + $0x1a0] sm:$0xff] }
  0x50   :  { %v449_v16 = vld [vmem:[#allocation9 + $0x110] sm:$0xff]  ;;  %v420_v25 = vld [vmem:[#allocation9 + $0x28] sm:$0xff]  ;;  %v470_v35 = vld [vmem:[#allocation9 + $0x1b8] sm:$0xff] }
  0x51   :  { %v452_v29 = vld [vmem:[#allocation9 + $0x128] sm:$0xff]  ;;  %v437_v31 = vld [vmem:[#allocation9 + $0xb0] sm:$0xff]  ;;  %v427_v8 = vld [vmem:[#allocation9 + $0x60] sm:$0xff] }
  0x52   :  { %v476_v7 = vld [vmem:[#allocation9 + $0x1e8] sm:$0xff] }
  0xc5   :  { %v75_v38 = vpop.xlane.xlu0 %74 }
  0xc6   :  { %v79_v39 = vmul.f32 0.0078125, %v75_v38  ;;  %v179_v38 = vld [vmem:[#allocation7 + $0x1e0] sm:$0xff] }
  0xc8   :  { %v1123_v40 = vsub.f32 %v72_v0, %v79_v39  ;;  %v155_v0 = vld [vmem:[#allocation7 + $0x120] sm:$0xff]  ;;  %v177_v39 = vld [vmem:[#allocation7 + $0x1d0] sm:$0xff] }
  0xc9   :  { %v77_v41 = vpop.xlane.xlu0 %76  ;;  %v783_v2 = vpack.c.bf16 %v155_v0, %v151_v63  ;;  %v464_v0 = vld [vmem:[#allocation9 + $0x188] sm:$0xff] }
  0xca   :  { %v80_v42 = vmul.f32 0.0078125, %v77_v41  ;;  %v83_v43 = vmul.f32 %v1123_v40, %v1123_v40  ;;  %v181_v41 = vld [vmem:[#allocation7 + $0x1f0] sm:$0xff] }
  0xcb   :  { %784 = vmatpush1.bf16.msra.mxu0 %v783_v2  ;;  %v416_v2 = vld [vmem:[#allocation9 + $0x8] sm:$0xff] }
  0xcc   :  { %v1127_v44 = vsub.f32 %v73_v1, %v80_v42  ;;  %85 = vadd.xlane.f32.xlu1 %v83_v43  ;;  %v813_v1 = vpack.c.bf16 %v158_v62, %v154_v60  ;;  %786 = vmatprep.subr.bf16.mxu0 %v785_v9  ;;  %v795_v42 = vpack.c.bf16 %v179_v38, %v175_v36  ;;  %v432_v62 = vld [vmem:[#allocation9 + $0x88] sm:$0xff]  ;;  %v465_v9 = vld [vmem:[#allocation9 + $0x190] sm:$0xff] }
  0xcd   :  { %v827_v43 = vpack.c.bf16 %v181_v41, %v177_v39  ;;  %v829_v63 = vpack.c.bf16 %v432_v62, %v431_v61  ;;  %v421_v36 = vld [vmem:[#allocation9 + $0x30] sm:$0xff]  ;;  %v474_v61 = vld [vmem:[#allocation9 + $0x1d8] sm:$0xff] }
  0xce   :  { %v84_v45 = vmul.f32 %v1127_v44, %v1127_v44  ;;  %814 = vmatprep.subr.bf16.mxu1 %v813_v1  ;;  %v415_v1 = vld [vmem:[#allocation9] sm:$0xff]  ;;  %v453_v41 = vld [vmem:[#allocation9 + $0x130] sm:$0xff] }
  0xcf   :  { %816 = vmatpush1.bf16.msra.mxu1 %v815_v5  ;;  %788 = vmatpush1.bf16.msra.mxu0 %v787_v14  ;;  %v831_v4 = vpack.c.bf16 %v416_v2, %v415_v1  ;;  %v447_v5 = vld [vmem:[#allocation9 + $0x100] sm:$0xff]  ;;  %v865_v14 = vpack.c.bf16 %v466_v11, %v465_v9  ;;  %v425_v62 = vld [vmem:[#allocation9 + $0x50] sm:$0xff]  ;;  %v458_v2 = vld [vmem:[#allocation9 + $0x158] sm:$0xff] }
  0xd0   :  { %87 = vadd.xlane.f32.xlu1 %v84_v45  ;;  %818 = vmatprep.subr.bf16.mxu1 %v817_v13  ;;  %v418_v13 = vld [vmem:[#allocation9 + $0x18] sm:$0xff]  ;;  %v457_v1 = vld [vmem:[#allocation9 + $0x150] sm:$0xff]  ;;  %v428_v9 = vld [vmem:[#allocation9 + $0x68] sm:$0xff] }
  0xd1   :  { %790 = vmatprep.subr.bf16.mxu0 %v789_v23  ;;  %v835_v15 = vpack.c.bf16 %v418_v13, %v417_v12  ;;  %v468_v23 = vld [vmem:[#allocation9 + $0x1a8] sm:$0xff]  ;;  %v855_v11 = vpack.c.bf16 %v428_v9, %v427_v8  ;;  %v459_v12 = vld [vmem:[#allocation9 + $0x160] sm:$0xff] }
  0xd2   :  { %v869_v26 = vpack.c.bf16 %v468_v23, %v467_v21  ;;  %v460_v13 = vld [vmem:[#allocation9 + $0x168] sm:$0xff]  ;;  %v430_v21 = vld [vmem:[#allocation9 + $0x78] sm:$0xff] }
  0xd3   :  { %820 = vmatpush1.bf16.msra.mxu1 %v819_v18  ;;  %792 = vmatpush1.bf16.msra.mxu0 %v791_v28  ;;  %v867_v18 = vpack.c.bf16 %v450_v17, %v449_v16  ;;  %v451_v28 = vld [vmem:[#allocation9 + $0x120] sm:$0xff]  ;;  %v446_v16 = vld [vmem:[#allocation9 + $0xf8] sm:$0xff]  ;;  %v477_v17 = vld [vmem:[#allocation9 + $0x1f0] sm:$0xff] }
  0xd4   :  { %822 = vmatprep.subr.bf16.mxu1 %v821_v24  ;;  %794 = vmatprep.subr.bf16.mxu0 %v793_v33  ;;  %v419_v24 = vld [vmem:[#allocation9 + $0x20] sm:$0xff]  ;;  %v871_v30 = vpack.c.bf16 %v452_v29, %v451_v28  ;;  %v469_v33 = vld [vmem:[#allocation9 + $0x1b0] sm:$0xff] }
  0xd5   :  { %v839_v27 = vpack.c.bf16 %v420_v25, %v419_v24  ;;  %v873_v38 = vpack.c.bf16 %v470_v35, %v469_v33  ;;  %v461_v24 = vld [vmem:[#allocation9 + $0x170] sm:$0xff]  ;;  %v462_v25 = vld [vmem:[#allocation9 + $0x178] sm:$0xff] }
  0xd7   :  { %824 = vmatpush1.bf16.msra.mxu1 %v823_v32  ;;  %796 = vmatpush1.bf16.msra.mxu0 %v795_v42  ;;  %v438_v32 = vld [vmem:[#allocation9 + $0xb8] sm:$0xff] }
  0xd8   :  { %826 = vmatprep.subr.bf16.mxu1 %v825_v37  ;;  %830 = vmatprep.subr.bf16.mxu0 %v829_v63  ;;  %v841_v34 = vpack.c.bf16 %v438_v32, %v437_v31  ;;  %v422_v37 = vld [vmem:[#allocation9 + $0x38] sm:$0xff]  ;;  %v183_v31 = vld [vmem:[%s1164_s4] sm:$0xf] }
  0xd9   :  { %v843_v39 = vpack.c.bf16 %v422_v37, %v421_v36  ;;  %v454_v42 = vld [vmem:[#allocation9 + $0x138] sm:$0xff] }
  0xdb   :  { %828 = vmatpush1.bf16.msra.mxu1 %v827_v43  ;;  %v875_v43 = vpack.c.bf16 %v454_v42, %v453_v41 }
 0x159   :  { %v86_v45 = vpop.xlane.xlu1 %85 }
 0x15a   :  { %v89_v46 = vmul.f32 0.0078125, %v86_v45  ;;  %v439_v45 = vld [vmem:[#allocation9 + $0xc0] sm:$0xff] }
 0x15c   :  { %v91_v47 = vadd.f32 1e-05, %v89_v46  ;;  %v440_v46 = vld [vmem:[#allocation9 + $0xc8] sm:$0xff] }
 0x15d   :  { %v88_v48 = vpop.xlane.xlu1 %87 }
 0x15e   :  { %902 = vrsqrt.f32 %v91_v47  ;;  %v90_v49 = vmul.f32 0.0078125, %v88_v48  ;;  %v471_v47 = vld [vmem:[#allocation9 + $0x1c0] sm:$0xff]  ;;  %v845_v48 = vpack.c.bf16 %v440_v46, %v439_v45 }
 0x160   :  { %v92_v50 = vadd.f32 1e-05, %v90_v49  ;;  %v472_v49 = vld [vmem:[#allocation9 + $0x1c8] sm:$0xff] }
 0x162   :  { %904 = vrsqrt.f32 %v92_v50  ;;  %v423_v50 = vld [vmem:[#allocation9 + $0x40] sm:$0xff] }
 0x168   :  { %v903_v51 = vpop.eup %902 }
 0x169   :  { %v95_v53 = vmul.f32 %v903_v51, %v1123_v40  ;;  %v463_v40 = vld [vmem:[#allocation9 + $0x180] sm:$0xff]  ;;  %v424_v51 = vld [vmem:[#allocation9 + $0x48] sm:$0xff] }
 0x16a   :  { %v861_v3 = vpack.c.bf16 %v464_v0, %v463_v40  ;;  %v426_v40 = vld [vmem:[#allocation9 + $0x58] sm:$0xff] }
 0x16b   :  { %v104_v55 = vmul.f32 %v678_v52, %v95_v53  ;;  %v847_v53 = vpack.c.bf16 %v424_v51, %v423_v50  ;;  %v851_v0 = vpack.c.bf16 %v426_v40, %v425_v62 }
 0x16c   :  { %v905_v56 = vpop.eup %904  ;;  %862 = vmatprep.subr.bf16.mxu1 %v861_v3  ;;  %v883_v3 = vpack.c.bf16 %v458_v2, %v457_v1 }
 0x16d   :  { %v113_v57 = vadd.f32 %v679_v54, %v104_v55  ;;  %v96_v58 = vmul.f32 %v905_v56, %v1127_v44  ;;  %v863_v44 = vpack.c.bf16 %v448_v6, %v447_v5  ;;  %v456_v55 = vld [vmem:[#allocation9 + $0x148] sm:$0xff]  ;;  %v475_v6 = vld [vmem:[#allocation9 + $0x1e0] sm:$0xff] }
 0x16e   :  { %v444_v5 = vld [vmem:[#allocation9 + $0xe8] sm:$0xff] }
 0x16f   :  { %270 = vmatmul.mubr.f32.vlgmr.msra.gmra.mrb[0].mxu0 %v113_v57  ;;  %347 = vmatmul.mubr.f32.vlgmr.msra.gmra.mrb[0].mxu1 %v113_v57  ;;  %v105_v59 = vmul.f32 %v678_v52, %v96_v58  ;;  %v877_v52 = vpack.c.bf16 %v472_v49, %v471_v47  ;;  %v441_v57 = vld [vmem:[#allocation9 + $0xd0] sm:$0xff]  ;;  %v442_v58 = vld [vmem:[#allocation9 + $0xd8] sm:$0xff] }
 0x170   :  { %275 = vmatprep.mubr.f32.mxu0 %v1039_v22  ;;  %352 = vmatprep.mubr.f32.mxu1 %v1039_v22  ;;  %v837_v22 = vpack.c.bf16 %v436_v20, %v435_v19  ;;  %v478_v19 = vld [vmem:[#allocation9 + $0x1f8] sm:$0xff]  ;;  %v429_v20 = vld [vmem:[#allocation9 + $0x70] sm:$0xff] }
 0x171   :  { %v114_v60 = vadd.f32 %v679_v54, %v105_v59  ;;  %832 = vmatpush3.bf16.msra.mxu0 %v831_v4  ;;  %864 = vmatpush3.bf16.msra.mxu1 %v863_v44  ;;  %v455_v54 = vld [vmem:[#allocation9 + $0x140] sm:$0xff]  ;;  %v473_v59 = vld [vmem:[#allocation9 + $0x1d0] sm:$0xff]  ;;  %v859_v23 = vpack.c.bf16 %v430_v21, %v429_v20 }
 0x172   :  { %834 = vmatprep.subr.bf16.mxu0 %v833_v10  ;;  %866 = vmatprep.subr.bf16.mxu1 %v865_v14  ;;  %v879_v56 = vpack.c.bf16 %v456_v55, %v455_v54  ;;  %v881_v63 = vpack.c.bf16 %v474_v61, %v473_v59  ;;  %v443_v4 = vld [vmem:[#allocation9 + $0xe0] sm:$0xff]  ;;  %v885_v10 = vpack.c.bf16 %v476_v7, %v475_v6 }
 0x173   :  { %276 = vmatmul.mubr.f32.gmra.mrb[2].mxu0 %v114_v60  ;;  %353 = vmatmul.mubr.f32.gmra.mrb[2].mxu1 %v114_v60  ;;  %v849_v60 = vpack.c.bf16 %v442_v58, %v441_v57  ;;  %v853_v44 = vpack.c.bf16 %v444_v5, %v443_v4  ;;  %v887_v14 = vpack.c.bf16 %v460_v13, %v459_v12 }
 0x175   :  { %836 = vmatpush3.bf16.msra.mxu0 %v835_v15  ;;  %868 = vmatpush3.bf16.msra.mxu1 %v867_v18  ;;  %v445_v15 = vld [vmem:[#allocation9 + $0xf0] sm:$0xff] }
 0x176   :  { %838 = vmatprep.subr.bf16.mxu0 %v837_v22  ;;  %870 = vmatprep.subr.bf16.mxu1 %v869_v26  ;;  %v857_v18 = vpack.c.bf16 %v446_v16, %v445_v15  ;;  %v889_v22 = vpack.c.bf16 %v478_v19, %v477_v17  ;;  %v891_v26 = vpack.c.bf16 %v462_v25, %v461_v24 }
 0x179   :  { %840 = vmatpush3.bf16.msra.mxu0 %v839_v27  ;;  %872 = vmatpush3.bf16.msra.mxu1 %v871_v30  ;;  %v185_v27 = vlaneseq }
 0x17a   :  { %842 = vmatprep.subr.bf16.mxu0 %v841_v34  ;;  %874 = vmatprep.subr.bf16.mxu1 %v873_v38 }
 0x17b   :  { %v186_v28 = vshrl.u32 %v185_v27, 7 }
 0x17d   :  { %844 = vmatpush3.bf16.msra.mxu0 %v843_v39  ;;  %876 = vmatpush3.bf16.msra.mxu1 %v875_v43  ;;  %v187_v29 = vsub.s32 0, %v186_v28  ;;  %v195_v30 = vsub.s32 2, %v186_v28  ;;  %v191_v32 = vsub.s32 1, %v186_v28  ;;  %v199_v33 = vsub.s32 3, %v186_v28 }
 0x17e   :  { %846 = vmatprep.subr.bf16.mxu0 %v845_v48  ;;  %878 = vmatprep.subr.bf16.mxu1 %v877_v52 }
 0x17f   :  { %v188_v34 = vrot.slane %v183_v31, %v187_v29  ;;  %v196_v35 = vrot.slane %v183_v31, %v195_v30  ;;  %v192_v36 = vrot.slane %v183_v31, %v191_v32  ;;  %v200_v37 = vrot.slane %v183_v31, %v199_v33 }
 0x181   :  { %848 = vmatpush3.bf16.msra.mxu0 %v847_v53  ;;  %880 = vmatpush3.bf16.msra.mxu1 %v879_v56 }
 0x182   :  { %850 = vmatprep.subr.bf16.mxu0 %v849_v60  ;;  %882 = vmatprep.subr.bf16.mxu1 %v881_v63 }
 0x185   :  { %852 = vmatpush3.bf16.msra.mxu0 %v851_v0  ;;  %884 = vmatpush3.bf16.msra.mxu1 %v883_v3 }
 0x186   :  { %854 = vmatprep.subr.bf16.mxu0 %v853_v44  ;;  %886 = vmatprep.subr.bf16.mxu1 %v885_v10 }
 0x189   :  { %856 = vmatpush3.bf16.msra.mxu0 %v855_v11  ;;  %888 = vmatpush3.bf16.msra.mxu1 %v887_v14 }
 0x18a   :  { %858 = vmatprep.subr.bf16.mxu0 %v857_v18  ;;  %890 = vmatprep.subr.bf16.mxu1 %v889_v22 }
 0x18d   :  { %860 = vmatpush3.bf16.msra.mxu0 %v859_v23  ;;  %892 = vmatpush3.bf16.msra.mxu1 %v891_v26 }
 0x242   :  { %v271_v38 = vpop.f32.mrb[0].mxu0  ;;  %v348_v39 = vpop.f32.mrb[0].mxu1 }
 0x243   :  { %v272_v41 = vadd.f32 %v271_v38, %v188_v34  ;;  %v349_v42 = vadd.f32 %v348_v39, %v196_v35  ;;  %v273_v43 = vpop.f32.mrb[1].mxu0  ;;  %v350_v45 = vpop.f32.mrb[1].mxu1 }
 0x244   :  { %v274_v46 = vadd.f32 %v273_v43, %v192_v36  ;;  %v351_v47 = vadd.f32 %v350_v45, %v200_v37 }
 0x245   :  { %v680_v48 = vmul.f32 -1.442695, %v272_v41  ;;  %v682_v49 = vmul.f32 -1.442695, %v349_v42 }
 0x246   :  { %v681_v50 = vmul.f32 -1.442695, %v274_v46  ;;  %v683_v51 = vmul.f32 -1.442695, %v351_v47  ;;  %v277_v52 = vpop.f32.mrb[2].mxu0  ;;  %v354_v53 = vpop.f32.mrb[2].mxu1 }
 0x247   :  { %906 = vpow2.f32 %v680_v48  ;;  %v278_v54 = vadd.f32 %v277_v52, %v188_v34  ;;  %v355_v55 = vadd.f32 %v354_v53, %v196_v35  ;;  %v279_v56 = vpop.f32.mrb[3].mxu0  ;;  %v356_v57 = vpop.f32.mrb[3].mxu1 }
 0x248   :  { %908 = vpow2.f32 %v682_v49  ;;  %v280_v58 = vadd.f32 %v279_v56, %v192_v36  ;;  %v357_v59 = vadd.f32 %v356_v57, %v200_v37  ;;  %v688_v36 = vld [vmem:[%s1166_s6] ss:$0 sm:$0xff] }
 0x249   :  { %910 = vpow2.f32 %v681_v50  ;;  %v684_v60 = vmul.f32 -1.442695, %v278_v54  ;;  %v686_v61 = vmul.f32 -1.442695, %v355_v55 }
 0x24a   :  { %912 = vpow2.f32 %v683_v51  ;;  %v685_v62 = vmul.f32 -1.442695, %v280_v58  ;;  %v687_v40 = vmul.f32 -1.442695, %v357_v59 }
 0x24b   :  { %914 = vpow2.f32 %v684_v60 }
 0x24c   :  { %916 = vpow2.f32 %v686_v61 }
 0x24d   :  { %918 = vpow2.f32 %v685_v62 }
 0x24e   :  { %920 = vpow2.f32 %v687_v40 }
 0x251   :  { %v907_v63 = vpop.eup %906 }
 0x252   :  { %v909_v0 = vpop.eup %908  ;;  %v383_v1 = vadd.f32 1.0, %v907_v63 }
 0x253   :  { %v911_v2 = vpop.eup %910  ;;  %v385_v3 = vadd.f32 1.0, %v909_v0 }
 0x254   :  { %v913_v4 = vpop.eup %912  ;;  %922 = vrcp.f32 %v383_v1  ;;  %v384_v5 = vadd.f32 1.0, %v911_v2 }
 0x255   :  { %v915_v6 = vpop.eup %914  ;;  %924 = vrcp.f32 %v385_v3  ;;  %v386_v44 = vadd.f32 1.0, %v913_v4 }
 0x256   :  { %v917_v7 = vpop.eup %916  ;;  %926 = vrcp.f32 %v384_v5  ;;  %v387_v8 = vadd.f32 1.0, %v915_v6 }
 0x257   :  { %v919_v9 = vpop.eup %918  ;;  %928 = vrcp.f32 %v386_v44  ;;  %v389_v10 = vadd.f32 1.0, %v917_v7 }
 0x258   :  { %v921_v11 = vpop.eup %920  ;;  %930 = vrcp.f32 %v387_v8  ;;  %v388_v12 = vadd.f32 1.0, %v919_v9 }
 0x259   :  { %932 = vrcp.f32 %v389_v10  ;;  %v390_v13 = vadd.f32 1.0, %v921_v11 }
 0x25a   :  { %934 = vrcp.f32 %v388_v12 }
 0x25b   :  { %936 = vrcp.f32 %v390_v13 }
 0x25e   :  { %v923_v14 = vpop.eup %922 }
 0x25f   :  { %v925_v15 = vpop.eup %924  ;;  %v407_v20 = vmul.f32 %v923_v14, %v272_v41 }
 0x260   :  { %v927_v16 = vpop.eup %926  ;;  %v409_v23 = vmul.f32 %v925_v15, %v349_v42 }
 0x261   :  { %v929_v17 = vpop.eup %928  ;;  %v408_v18 = vmul.f32 %v927_v16, %v274_v46 }
 0x262   :  { %v931_v19 = vpop.eup %930  ;;  %v410_v21 = vmul.f32 %v929_v17, %v351_v47 }
 0x263   :  { %v933_v22 = vpop.eup %932  ;;  %543 = vmatprep.mubr.f32.mxu0 %v408_v18  ;;  %v411_v27 = vmul.f32 %v931_v19, %v278_v54 }
 0x264   :  { %v935_v24 = vpop.eup %934  ;;  %618 = vmatprep.mubr.f32.mxu1 %v410_v21  ;;  %544 = vmatmul.mubr.f32.vlgmr.msra.gmra.mrb[4].mxu0 %v407_v20  ;;  %v413_v29 = vmul.f32 %v933_v22, %v355_v55 }
 0x265   :  { %v937_v25 = vpop.eup %936  ;;  %v412_v26 = vmul.f32 %v935_v24, %v280_v58  ;;  %619 = vmatmul.mubr.f32.vlgmr.msra.gmra.mrb[4].mxu1 %v409_v23 }
 0x266   :  { %v414_v28 = vmul.f32 %v937_v25, %v357_v59 }
 0x267   :  { %548 = vmatprep.mubr.f32.mxu0 %v412_v26 }
 0x268   :  { %623 = vmatprep.mubr.f32.mxu1 %v414_v28  ;;  %549 = vmatmul.mubr.f32.gmra.mrb[6].mxu0 %v411_v27 }
 0x269   :  { %624 = vmatmul.mubr.f32.gmra.mrb[6].mxu1 %v413_v29 }
 0x337   :  { %v721_v30 = vpop.f32.mrb[4].mxu0 }
 0x338   :  { %v759_v31 = vpop.f32.mrb[4].mxu1  ;;  %v722_v32 = vpop.f32.mrb[5].mxu0 }
 0x339   :  { %v723_v33 = vadd.f32 %v722_v32, %v721_v30  ;;  %v760_v34 = vpop.f32.mrb[5].mxu1 }
 0x33a   :  { %v761_v35 = vadd.f32 %v760_v34, %v759_v31 }
 0x33b   :  { %v724_v37 = vpop.f32.mrb[6].mxu0 }
 0x33c   :  { %v621_v38 = vadd.f32 %v761_v35, %v723_v33  ;;  %v762_v39 = vpop.f32.mrb[6].mxu1  ;;  %v725_v41 = vpop.f32.mrb[7].mxu0 }
 0x33d   :  { %v726_v42 = vadd.f32 %v725_v41, %v724_v37  ;;  %v763_v43 = vpop.f32.mrb[7].mxu1 }
 0x33e   :  { %v656_v45 = vadd.f32 %v688_v36, %v621_v38  ;;  %v764_v46 = vadd.f32 %v763_v43, %v762_v39 }
 0x340   :  { %658 = vst [vmem:[#allocation10] sm:$0xff] %v656_v45  ;;  %v626_v47 = vadd.f32 %v764_v46, %v726_v42 }
 0x342   :  { %v657_v48 = vadd.f32 %v688_v36, %v626_v47 }
 0x344   :  { %659 = vst [vmem:[#allocation10 + $0x8] sm:$0xff] %v657_v48 }
 0x345   :  { %1015 = shalt.err (!%p1012_p0)
}
 0x346   :  { %s1016_s24 = scalar_lea.hbm %s1167_s7, 256 }
 0x347   :  { %p1017_p1 = scmp.ne.s32.totalorder %s1167_s7, %s1016_s24  ;;  %p1020_p2 = scmp.lt.u32.totalorder %s1016_s24, %s1167_s7 }
 0x349   :  { %p1022_p3 = pnand %p1020_p2, %p1017_p1 }
 0x34b   :  { %1025 = shalt.err (!%p1022_p3)
}
 0x34c   :  { %671 = dma.vmem_to_hbm [thread:$0]  %s666_s21, 256, %s1167_s7, [#allocation6], %s1036_s3, %s1036_s3, %s1037_s25  }
 0x34d   :  { %1030 = dma.done.wait [#allocation6], 256  }
 0x34e   :  { %1031 = vsyncadd [#allocation6], 4294967040 }
 0x34f   :  { %675 = vsyncpa [#allocation5], 1 }
 0x350   :  { %676 = vsyncpa [#allocation8], 1 }
 0x351   :  { %677 = vsyncpa [#allocation6], 1 }

</bundles_post_ra>
